<compile_context>
chip_gen: v5e
topology: v5e:2x2
jax: 0.10.0
libtpu: 0.0.40
codegen_flags: <defaults>
</compile_context>

<pallas_src>
import numpy as np
import jax
import jax.numpy as jnp
from jax.experimental import pallas as pl
from jax.experimental.pallas import tpu as pltpu


_INV_SQRT2 = 0.7071067811865476


def _erf_poly(x):
    """Abramowitz & Stegun 7.1.26 rational approximation of erf (|err|<=1.5e-7)."""
    a1, a2, a3, a4, a5 = (0.254829592, -0.284496736, 1.421413741,
                          -1.453152027, 1.061405429)
    p = 0.3275911
    ax = jnp.abs(x)
    denom = 1.0 + p * ax
    # EUP approximate reciprocal seed + one Newton-Raphson refinement:
    # divide stays off the VALU, accuracy is restored to ~f32 exact.
    r = pl.reciprocal(denom, approx=True)
    t = r * (2.0 - denom * r)
    poly = ((((a5 * t + a4) * t + a3) * t + a2) * t + a1) * t
    y = 1.0 - poly * jnp.exp(-ax * ax)
    return jnp.where(x >= 0.0, y, -y)


def _gelu_exact(x):
    """torch.nn.GELU() (erf form): 0.5 * x * (1 + erf(x / sqrt(2)))."""
    return 0.5 * x * (1.0 + _erf_poly(x * _INV_SQRT2))


def _diffusion_mlp_kernel(x_ref, wf_ref, b1_ref, w2_ref, b2_ref, o_ref):
    # Token-on-lane layout: the last dim of every block is the token axis.
    #   x_ref : (d_in, tn)   packed [y | t | y_hat]^T, tokens on lanes
    #   wf_ref: (H, d_in)    (W_in @ W1)^T  -- projections folded into fc1
    #   b1_ref: (H, 1)
    #   w2_ref: (y_dim, H)   fc2 weight, transposed
    #   b2_ref: (y_dim, 1)
    #   o_ref : (y_dim, tn)
    x = x_ref[...].astype(jnp.float32)

    # fc1( proj_y(y) + proj_t(t) + proj_y_hat(y_hat) )  ==  Wf^T @ x^T + b1
    h = jnp.dot(wf_ref[...].astype(jnp.float32), x,
                preferred_element_type=jnp.float32)
    h = h + b1_ref[...].astype(jnp.float32)

    # exact GELU (lane-dense VPU/EUP work)
    h = _gelu_exact(h)

    # fc2
    o = jnp.dot(w2_ref[...].astype(jnp.float32), h,
                preferred_element_type=jnp.float32)
    o = o + b2_ref[...].astype(jnp.float32)

    o_ref[...] = o.astype(o_ref.dtype)


def diffusion_model_forward(params, y, t, y_hat, *, token_tile=4096):
    """Fused forward of DiffusionModel.

    params: dict with
      'wy'  : (y_dim, H)   (in, out) layout, i.e. torch Linear.weight.T
      'wt'  : (t_dim, H)
      'wyh' : (y_dim, H)
      'w1'  : (H, H),  'b1': (H,)
      'w2'  : (H, y_dim), 'b2': (y_dim,)
    y, y_hat: (..., y_dim);  t: (..., t_dim) or (...,) (unsqueezed like torch).

    token_tile: tokens (lanes) per grid step; multiple of 128. Sweep upward
    for large N; keep >= 2 tiles so the "parallel" grid axis can shard across
    both v7x TensorCores.
    """
    if t.ndim == y.ndim - 1:          # mirrors `if len(t.shape)==1: t.unsqueeze(-1)`
        t = t[..., None]

    y_dim = y.shape[-1]
    t_dim = t.shape[-1]
    lead = y.shape[:-1]
    N = int(np.prod(lead)) if lead else 1

    wy, wt, wyh = params['wy'], params['wt'], params['wyh']
    w1, b1 = params['w1'], params['b1']
    w2, b2 = params['w2'], params['b2']
    H = w1.shape[0]
    d_in = 2 * y_dim + t_dim

    # Pack activations token-on-lane: (d_in, N), tokens on the fast (lane) axis.
    x_t = jnp.concatenate(
        [y.reshape(N, y_dim).T, t.reshape(N, t_dim).T, y_hat.reshape(N, y_dim).T],
        axis=0)

    # Fold the three bias-free projections into fc1:
    #   fc1(x @ W_in) = x @ (W_in @ W1) + b1   (exact up to f32 rounding)
    w_in = jnp.concatenate([wy, wt, wyh], axis=0)            # (d_in, H)
    wf_t = (w_in.astype(jnp.float32) @ w1.astype(jnp.float32)).T  # (H, d_in)
    w2_t = w2.T                                              # (y_dim, H)
    b1_c = b1.reshape(H, 1)
    b2_c = b2.reshape(y_dim, 1)

    tn = int(token_tile)
    assert tn % 128 == 0, "token_tile must be a multiple of 128 (lane tiling)"
    # No jnp.pad: Pallas clips the final partial block (OOB lanes never stored).
    n_tiles = pl.cdiv(N, tn)

    resident = lambda r, c: pl.BlockSpec((r, c), lambda i: (0, 0))

    out_t = pl.pallas_call(
        _diffusion_mlp_kernel,
        out_shape=jax.ShapeDtypeStruct((y_dim, N), y.dtype),
        grid_spec=pltpu.PrefetchScalarGridSpec(
            num_scalar_prefetch=0,
            grid=(n_tiles,),
            in_specs=[
                pl.BlockSpec((d_in, tn), lambda i: (0, i)),   # packed activations
                resident(H, d_in),                            # Wf^T (VMEM resident)
                resident(H, 1),                               # b1
                resident(y_dim, H),                           # W2^T
                resident(y_dim, 1),                           # b2
            ],
            out_specs=pl.BlockSpec((y_dim, tn), lambda i: (0, i)),
        ),
        compiler_params=pltpu.CompilerParams(
            dimension_semantics=("parallel",)),
    )(x_t, wf_t, b1_c, w2_t, b2_c)

    return out_t.T.reshape(*lead, y_dim)


def _reference(params, y, t, y_hat):
    """Pure-JAX mirror of the torch forward (exact erf GELU)."""
    if t.ndim == y.ndim - 1:
        t = t[..., None]
    h = (y.astype(jnp.float32) @ params['wy']
         + t.astype(jnp.float32) @ params['wt']
         + y_hat.astype(jnp.float32) @ params['wyh'])
    h = h @ params['w1'] + params['b1']
    h = jax.nn.gelu(h, approximate=False)
    return h @ params['w2'] + params['b2']


if __name__ == "__main__":
    # Module "args": y_dim=3 (CA coords), t_dim=1 (timestep), hidden_features=32.
    y_dim, t_dim, H = 3, 1, 32
    B, L = 2, 200                 # N = 400; tile 256 -> grid=(2,) with a partial 2nd tile

    key = jax.random.PRNGKey(0)
    ks = jax.random.split(key, 10)

    params = {
        # (in, out) layout == torch Linear.weight.T
        'wy':  (jax.random.normal(ks[0], (y_dim, H), jnp.float32) / np.sqrt(y_dim)),
        'wt':  (jax.random.normal(ks[1], (t_dim, H), jnp.float32) / np.sqrt(t_dim)),
        'wyh': (jax.random.normal(ks[2], (y_dim, H), jnp.float32) / np.sqrt(y_dim)),
        'w1':  (jax.random.normal(ks[3], (H, H), jnp.float32) / np.sqrt(H)),
        'b1':  0.1 * jax.random.normal(ks[4], (H,), jnp.float32),
        'w2':  (jax.random.normal(ks[5], (H, y_dim), jnp.float32) / np.sqrt(H)),
        'b2':  0.1 * jax.random.normal(ks[6], (y_dim,), jnp.float32),
    }

    y     = jax.random.normal(ks[7], (B, L, y_dim), jnp.float32)
    y_hat = jax.random.normal(ks[8], (B, L, y_dim), jnp.float32)
    t     = jax.random.uniform(ks[9], (B, L), jnp.float32)   # missing last dim -> unsqueezed

    out = diffusion_model_forward(params, y, t, y_hat, token_tile=256)
    jax.block_until_ready(out)

    ref = _reference(params, y, t, y_hat)
    # Tolerance budget: A&S erf poly (~2e-7), folded-weight f32 rounding (~1e-6),
    # NR-refined approximate reciprocal (<1e-6).
    np.testing.assert_allclose(np.asarray(out), np.asarray(ref), rtol=2e-4, atol=3e-5)

    print("KERNEL_OK")
</pallas_src>

<mosaic_0001>
module attributes {stable_mosaic.version = 11 : i64} {
  func.func @_diffusion_mlp_kernel(%arg0: i32, %arg1: memref<7x256xf32, #tpu.memory_space<vmem>>, %arg2: memref<32x7xf32, #tpu.memory_space<vmem>>, %arg3: memref<32x1xf32, #tpu.memory_space<vmem>>, %arg4: memref<3x32xf32, #tpu.memory_space<vmem>>, %arg5: memref<3x1xf32, #tpu.memory_space<vmem>>, %arg6: memref<3x256xf32, #tpu.memory_space<vmem>>) attributes {dimension_semantics = [#tpu.dimension_semantics<parallel>], iteration_bounds = array<i64: 2>, scalar_prefetch = 0 : i64, scratch_operands = 0 : i64, tpu.core_type = #tpu.core_type<tc>, window_params = [{transform_indices = @transform_0, window_bounds = array<i64: 7, 256>}, {pipeline_mode = #tpu.pipeline_mode<synchronous>, transform_indices = @transform_1, window_bounds = array<i64: 32, 7>}, {pipeline_mode = #tpu.pipeline_mode<synchronous>, transform_indices = @transform_2, window_bounds = array<i64: 32, 1>}, {pipeline_mode = #tpu.pipeline_mode<synchronous>, transform_indices = @transform_3, window_bounds = array<i64: 3, 32>}, {pipeline_mode = #tpu.pipeline_mode<synchronous>, transform_indices = @transform_4, window_bounds = array<i64: 3, 1>}, {transform_indices = @transform_5, window_bounds = array<i64: 3, 256>}]} {
    %c0 = arith.constant 0 : index
    %c0_0 = arith.constant 0 : index
    %0 = vector.load %arg1[%c0, %c0_0] : memref<7x256xf32, #tpu.memory_space<vmem>>, vector<7x256xf32>
    %c0_1 = arith.constant 0 : index
    %c0_2 = arith.constant 0 : index
    %1 = vector.load %arg2[%c0_1, %c0_2] : memref<32x7xf32, #tpu.memory_space<vmem>>, vector<32x7xf32>
    %cst = arith.constant dense<0.000000e+00> : vector<32x256xf32>
    %2 = tpu.matmul %1, %0, %cst {dimension_numbers = #tpu.dot_dimension_numbers<[1], [0], [0], [1], [0, 0, 1, 1], [], []>} : vector<32x7xf32>, vector<7x256xf32>, vector<32x256xf32> -> vector<32x256xf32>
    %c0_3 = arith.constant 0 : index
    %c0_4 = arith.constant 0 : index
    %3 = vector.load %arg3[%c0_3, %c0_4] : memref<32x1xf32, #tpu.memory_space<vmem>>, vector<32x1xf32>
    %4 = vector.broadcast %3 : vector<32x1xf32> to vector<32x256xf32>
    %5 = arith.addf %2, %4 : vector<32x256xf32>
    %cst_5 = arith.constant 5.000000e-01 : f32
    %6 = vector.broadcast %cst_5 : f32 to vector<32x256xf32>
    %7 = arith.mulf %6, %5 : vector<32x256xf32>
    %cst_6 = arith.constant 0.707106769 : f32
    %8 = vector.broadcast %cst_6 : f32 to vector<32x256xf32>
    %9 = arith.mulf %5, %8 : vector<32x256xf32>
    %10 = math.absf %9 : vector<32x256xf32>
    %cst_7 = arith.constant 0.327591091 : f32
    %11 = vector.broadcast %cst_7 : f32 to vector<32x256xf32>
    %12 = arith.mulf %11, %10 : vector<32x256xf32>
    %cst_8 = arith.constant 1.000000e+00 : f32
    %13 = vector.broadcast %cst_8 : f32 to vector<32x256xf32>
    %14 = arith.addf %13, %12 : vector<32x256xf32>
    %15 = tpu.reciprocal %14 {approx = true} : vector<32x256xf32> -> vector<32x256xf32>
    %16 = arith.mulf %14, %15 : vector<32x256xf32>
    %cst_9 = arith.constant 2.000000e+00 : f32
    %17 = vector.broadcast %cst_9 : f32 to vector<32x256xf32>
    %18 = arith.subf %17, %16 : vector<32x256xf32>
    %19 = arith.mulf %15, %18 : vector<32x256xf32>
    %cst_10 = arith.constant 1.06140542 : f32
    %20 = vector.broadcast %cst_10 : f32 to vector<32x256xf32>
    %21 = arith.mulf %20, %19 : vector<32x256xf32>
    %cst_11 = arith.constant -1.45315206 : f32
    %22 = vector.broadcast %cst_11 : f32 to vector<32x256xf32>
    %23 = arith.addf %21, %22 : vector<32x256xf32>
    %24 = arith.mulf %23, %19 : vector<32x256xf32>
    %cst_12 = arith.constant 1.42141378 : f32
    %25 = vector.broadcast %cst_12 : f32 to vector<32x256xf32>
    %26 = arith.addf %24, %25 : vector<32x256xf32>
    %27 = arith.mulf %26, %19 : vector<32x256xf32>
    %cst_13 = arith.constant -0.284496725 : f32
    %28 = vector.broadcast %cst_13 : f32 to vector<32x256xf32>
    %29 = arith.addf %27, %28 : vector<32x256xf32>
    %30 = arith.mulf %29, %19 : vector<32x256xf32>
    %cst_14 = arith.constant 0.254829586 : f32
    %31 = vector.broadcast %cst_14 : f32 to vector<32x256xf32>
    %32 = arith.addf %30, %31 : vector<32x256xf32>
    %33 = arith.mulf %32, %19 : vector<32x256xf32>
    %cst_15 = arith.constant 0.000000e+00 : f32
    %34 = vector.broadcast %cst_15 : f32 to vector<32x256xf32>
    %35 = arith.subf %34, %10 : vector<32x256xf32>
    %36 = arith.mulf %35, %10 : vector<32x256xf32>
    %37 = math.exp %36 : vector<32x256xf32>
    %38 = arith.mulf %33, %37 : vector<32x256xf32>
    %cst_16 = arith.constant 1.000000e+00 : f32
    %39 = vector.broadcast %cst_16 : f32 to vector<32x256xf32>
    %40 = arith.subf %39, %38 : vector<32x256xf32>
    %cst_17 = arith.constant 0.000000e+00 : f32
    %41 = vector.broadcast %cst_17 : f32 to vector<32x256xf32>
    %42 = arith.cmpf oge, %9, %41 : vector<32x256xf32>
    %cst_18 = arith.constant 0.000000e+00 : f32
    %43 = vector.broadcast %cst_18 : f32 to vector<32x256xf32>
    %44 = arith.subf %43, %40 : vector<32x256xf32>
    %45 = arith.select %42, %40, %44 : vector<32x256xi1>, vector<32x256xf32>
    %cst_19 = arith.constant 1.000000e+00 : f32
    %46 = vector.broadcast %cst_19 : f32 to vector<32x256xf32>
    %47 = arith.addf %46, %45 : vector<32x256xf32>
    %48 = arith.mulf %7, %47 : vector<32x256xf32>
    %c0_20 = arith.constant 0 : index
    %c0_21 = arith.constant 0 : index
    %49 = vector.load %arg4[%c0_20, %c0_21] : memref<3x32xf32, #tpu.memory_space<vmem>>, vector<3x32xf32>
    %cst_22 = arith.constant dense<0.000000e+00> : vector<3x256xf32>
    %50 = tpu.matmul %49, %48, %cst_22 {dimension_numbers = #tpu.dot_dimension_numbers<[1], [0], [0], [1], [0, 0, 1, 1], [], []>} : vector<3x32xf32>, vector<32x256xf32>, vector<3x256xf32> -> vector<3x256xf32>
    %c0_23 = arith.constant 0 : index
    %c0_24 = arith.constant 0 : index
    %51 = vector.load %arg5[%c0_23, %c0_24] : memref<3x1xf32, #tpu.memory_space<vmem>>, vector<3x1xf32>
    %52 = vector.broadcast %51 : vector<3x1xf32> to vector<3x256xf32>
    %53 = arith.addf %50, %52 : vector<3x256xf32>
    %c0_25 = arith.constant 0 : index
    %c0_26 = arith.constant 0 : index
    %54 = vector.load %arg6[%c0_25, %c0_26] : memref<3x256xf32, #tpu.memory_space<vmem>>, vector<3x256xf32>
    tpu.vector_store %arg6[%c0_25, %c0_26], %53 {strides = array<i32>} : memref<3x256xf32, #tpu.memory_space<vmem>>, vector<3x256xf32>,
    return
  }
  func.func @transform_0(%arg0: i32) -> (i32, i32) {
    %c0_i32 = arith.constant 0 : i32
    %c0_i32_0 = arith.constant 0 : i32
    return %c0_i32, %arg0 : i32, i32
  }
  func.func @transform_1(%arg0: i32) -> (i32, i32) {
    %c0_i32 = arith.constant 0 : i32
    %c0_i32_0 = arith.constant 0 : i32
    %c0_i32_1 = arith.constant 0 : i32
    return %c0_i32, %c0_i32_0 : i32, i32
  }
  func.func @transform_2(%arg0: i32) -> (i32, i32) {
    %c0_i32 = arith.constant 0 : i32
    %c0_i32_0 = arith.constant 0 : i32
    %c0_i32_1 = arith.constant 0 : i32
    return %c0_i32, %c0_i32_0 : i32, i32
  }
  func.func @transform_3(%arg0: i32) -> (i32, i32) {
    %c0_i32 = arith.constant 0 : i32
    %c0_i32_0 = arith.constant 0 : i32
    %c0_i32_1 = arith.constant 0 : i32
    return %c0_i32, %c0_i32_0 : i32, i32
  }
  func.func @transform_4(%arg0: i32) -> (i32, i32) {
    %c0_i32 = arith.constant 0 : i32
    %c0_i32_0 = arith.constant 0 : i32
    %c0_i32_1 = arith.constant 0 : i32
    return %c0_i32, %c0_i32_0 : i32, i32
  }
  func.func @transform_5(%arg0: i32) -> (i32, i32) {
    %c0_i32 = arith.constant 0 : i32
    %c0_i32_0 = arith.constant 0 : i32
    return %c0_i32, %arg0 : i32, i32
  }
}

</mosaic_0001>

<bundles_post_ra>
// kernel: tpu_custom_call.1
= control target key start
LH: loop header
LB: loop body
LE: loop exit
PB: predicated region body
PF: predicated region fallthrough
CT: control target
= control target key end

     0   :  { %10 = vsyncpa [#allocation3], 0  ;;  %s1158_s0 = inlined_call_operand.vmem [shape: f32[7,400], index: 0, kind: input, shape index: {}]   ;;  %s1159_s1 = inlined_call_operand.vmem [shape: f32[32,7], index: 1, kind: input, shape index: {}]   ;;  %s1160_s2 = inlined_call_operand.vmem [shape: f32[32,1], index: 2, kind: input, shape index: {}]   ;;  %s1161_s3 = inlined_call_operand.vmem [shape: f32[3,32], index: 3, kind: input, shape index: {}]   ;;  %s1162_s4 = inlined_call_operand.vmem [shape: f32[3,1], index: 4, kind: input, shape index: {}]   ;;  %s1163_s5 = inlined_call_operand.hbm [shape: f32[3,400], index: 5, kind: output, shape index: {}]  }
   0x1   :  { %12 = vsyncpa [#allocation3 + $0x1], 0  ;;  %s897_s18 = smov 0   ;;  %s899_s19 = smov 0  }
   0x2   :  { %s901_s20 = smov 0   ;;  %s903_s21 = smov 0  }
   0x3 LB: > { %s918_s22 = sadd.s32 4294967295, %s864_s21   ;;  %s700_s23 = sadd.s32 4294967294, %s864_s21   ;;  %s864_s21 = sphi %s903_s21, %s1169_s21   ;;  %s860_s20 = sphi %s901_s20, %s1168_s20   ;;  %s856_s19 = sphi %s899_s19, %s1167_s19   ;;  %s852_s18 = sphi %s897_s18, %s1166_s18  }
   0x4   : > { %s922_s24 = sadd.s32 1, %s864_s21   ;;  %s135_s25 = sadd.s32 1, %s860_s20 }
   0x5   : > { %s132_s26 = ssub.s32 %s864_s21, %s922_s24  ;;  %p145_p0 = scmp.ne.s32.totalorder %s860_s20, %s856_s19 }
   0x6   : > { %p133_p1 = scmp.eq.s32.totalorder %s132_s26, 0  ;;  %p146_p2 = scmp.eq.s32.totalorder %s918_s22, 1 }
   0x7   : > { %p151_p3 = scmp.ne.s32.totalorder %s856_s19, %s852_s18  ;;  %p152_p4 = scmp.eq.s32.totalorder %s700_s23, 1 }
   0x8   : > { %s933_s27 = scalar_select %p133_p1, %s860_s20, %s135_s25  }
   0x9   : > { %p935_p5 = por %p146_p2, %p145_p0  ;;  %p939_p6 = por %p152_p4, %p151_p3 }
   0xa   : > { %p703_p7 = scmp.ge.s32.totalorder %s864_s21, 1  ;;  %p191_p8 = scmp.lt.s32.totalorder %s864_s21, 3 }
   0xc   : > { %p192_p9 = pnand %p703_p7, %p191_p8 }
   0xd   : > { %s705_s30 = sshll.u32 (!%p192_p9), %s918_s22, 1  ;;  %s216_s14 = sand.u32 (!%p192_p9), 1, %s856_s19  }
   0xe   : > { %195 = sbr.rel (%p192_p9) target bundleno = 365 (0x16d), region = 40  ;;  %p220_p10 = scmp.lt.s32.totalorder (!%p192_p9), %s705_s30, 3 }
   0xf   : > { %s704_s15 = sshll.u32 (!%p192_p9), %s216_s14, 3  ;;  %s724_s16 = sshll.u32 (!%p192_p9), %s918_s22, 3 }
  0x10   : > { %s636_s25 = scalar_lea.hbm (!%p192_p9), %s1163_s5, %s724_s16  ;;  %s218_s26 = scalar_lea.vmem (!%p192_p9), [#allocation2], %s704_s15 }
  0x11   : > { %s640_s6 = sshll.u32 (!%p192_p9), %s636_s25, 4  ;;  %s625_s22 = scalar_lea.sflag (!%p192_p9), [#allocation3], %s216_s14  ;;  %s641_s6 = int_to_ptr.hbm [resolvable:$true] %s640_s6 }
  0x12   : > { %s816_s7 = sshra.s32 (!%p192_p9), %s641_s6, 4  ;;  %s822_s11 = scalar_lea.hbm (!%p192_p9), %s1163_s5, 16  ;;  %s817_s7 = int_to_ptr.hbm [resolvable:$true] %s816_s7 }
  0x13   : > { %v866_v0 = vmov 0   ;;  %v233_v1 = vld [vmem:[%s1160_s2 + $0x8] sm:$0xff]  ;;  %v235_v2 = vld [vmem:[%s1160_s2 + $0x18] sm:$0xff]  ;;  %s1171_s30 = smov (!%p220_p10, %s705_s30), 3  ;;  %vm269_vm0 = vcmask 1046528   ;;  %v228_v3 = vld [vmem:[%s1159_s1] sm:$0xff]  ;;  %p823_p0 = scmp.lt.s32.totalorder %s817_s7, %s1163_s5 }
  0x14   : > { %768 = vset.pattern.permute.xlu1 %v866_v0  ;;  %767 = vset.pattern.permute.xlu0 %v866_v0  ;;  %s706_s10 = sshll.u32 %s1171_s30, 3  ;;  %vm256_vm1 = vcmask 56320   ;;  %v231_v6 = vld [vmem:[%s1159_s1 + $0x18] sm:$0xff]  ;;  %v232_v7 = vld [vmem:[%s1160_s2] sm:$0xff]  ;;  %v234_v8 = vld [vmem:[%s1160_s2 + $0x10] sm:$0xff]  ;;  %vm573_vm10 = vcmask 261120  }
  0x15   : > { %243 = vperm.xlu1 %768, %v233_v1   ;;  %253 = vperm.xlu0 %767, %v235_v2   ;;  %s223_s13 = scalar_lea.vmem %s1158_s0, %s706_s10  ;;  %v229_v9 = vld [vmem:[%s1159_s1 + $0x8] sm:$0xff]  ;;  %v230_v10 = vld [vmem:[%s1159_s1 + $0x10] sm:$0xff]  ;;  %s638_s30 = sshll.u32 %s218_s26, 4  ;;  %vm620_vm11 = vcmask 1043456   ;;  %s639_s30 = int_to_ptr.vmem [resolvable:$true] %s638_s30 }
  0x16   : > { %769 = vset.pattern.permute.xlu2 %v866_v0  ;;  %v226_v4 = vld [vmem:[%s223_s13] sm:$0x7f]  ;;  %v227_v5 = vld [vmem:[%s223_s13 + $0x8] sm:$0x7f]  ;;  %s818_s8 = scalar_lea.hbm %s817_s7, 8 }
  0x17   : > { %707 = vmatpush.msk.msra.mxu0 %vm269_vm0, %v226_v4  ;;  %725 = vmatpush.msk.msra.mxu2 %vm269_vm0, %v226_v4  ;;  %p819_p11 = scmp.ne.s32.totalorder %s817_s7, %s818_s8  ;;  %p824_p1 = scmp.lt.s32.totalorder %s822_s11, %s818_s8 }
  0x18   : > { %712 = vmatpush.msk.msra.mxu1 %vm269_vm0, %v227_v5  ;;  %726 = vmatpush.msk.msra.mxu3 %vm269_vm0, %v227_v5 }
  0x19   : > { %708 = vmatmul.msk.f32.vlgmr.msra.gmra.mxu0 %vm256_vm1, %v228_v3  ;;  %711 = vmatmul.msk.f32.vlgmr.msra.gmra.mxu2 %vm256_vm1, %v231_v6  ;;  %p820_p12 = pnand %p819_p11, %p935_p5  ;;  %p825_p2 = por %p824_p1, %p823_p0 }
  0x1a   : > { %713 = vmatmul.msk.f32.vlgmr.msra.gmra.mxu1 %vm256_vm1, %v228_v3  ;;  %716 = vmatmul.msk.f32.vlgmr.msra.gmra.mxu3 %vm256_vm1, %v231_v6 }
  0x1b   : > { %p821_p13 = pneg %p820_p12 }
  0x1d   : > { %238 = vperm.xlu1 %768, %v232_v7   ;;  %248 = vperm.xlu0 %767, %v234_v8   ;;  %p826_p3 = pnand %p825_p2, %p821_p13 }
  0x21   : > { %709 = vmatmul.msk.f32.gmra.mxu0 %vm256_vm1, %v229_v9 }
  0x22   : > { %714 = vmatmul.msk.f32.gmra.mxu1 %vm256_vm1, %v229_v9 }
  0x29   : > { %710 = vmatmul.msk.f32.gmra.mxu0 %vm256_vm1, %v230_v10 }
  0x2a   : > { %715 = vmatmul.msk.f32.gmra.mxu1 %vm256_vm1, %v230_v10 }
  0x87   : > { %v244_v11 = vpop.permute.xlu1 %243  ;;  %v254_v20 = vpop.permute.xlu0 %253 }
  0x8f   : > { %v239_v12 = vpop.permute.xlu1 %238  ;;  %v249_v59 = vpop.permute.xlu0 %248 }
  0x96   : > { %v293_v13 = vpop.f32.mrf.mxu0 }
  0x97   : > { %v981_v14 = vadd.f32 %v293_v13, %v239_v12  ;;  %v322_v15 = vpop.f32.mrf.mxu1 }
  0x98   : > { %v983_v16 = vadd.f32 %v322_v15, %v239_v12 }
  0x99   : > { %v986_v17 = vmul.f32 0.70710677, %v981_v14 }
  0x9a   : > { %v989_v18 = vmul.f32 0.70710677, %v983_v16 }
  0x9b   : > { %v350_v19 = vand.u32 2147483647, %v986_v17  ;;  %vm526_vm5 = vcmp.ge.f32.partialorder %v986_v17, 0.0 }
  0x9c   : > { %v351_v21 = vand.u32 2147483647, %v989_v18  ;;  %v302_v22 = vpop.f32.mrf.mxu2  ;;  %vm527_vm7 = vcmp.ge.f32.partialorder %v989_v18, 0.0 }
  0x9d   : > { %v358_v23 = vmul.f32 0.3275911, %v350_v19  ;;  %v303_v24 = vadd.f32 %v302_v22, %v254_v20  ;;  %v331_v25 = vpop.f32.mrf.mxu3  ;;  %v478_v40 = vsub.f32 0.0, %v350_v19 }
  0x9e   : > { %v359_v26 = vmul.f32 0.3275911, %v351_v21  ;;  %v993_v27 = vadd.f32 %v331_v25, %v254_v20  ;;  %v296_v30 = vpop.f32.mrf.mxu0  ;;  %v479_v49 = vsub.f32 0.0, %v351_v21 }
  0x9f   : > { %v366_v28 = vadd.f32 1.0, %v358_v23  ;;  %v995_v29 = vmul.f32 0.70710677, %v303_v24  ;;  %v325_v33 = vpop.f32.mrf.mxu1  ;;  %v1002_v37 = vadd.f32 %v296_v30, %v244_v11  ;;  %v486_v51 = vmul.f32 %v478_v40, %v350_v19 }
  0xa0   : > { %v367_v31 = vadd.f32 1.0, %v359_v26  ;;  %v998_v32 = vmul.f32 0.70710677, %v993_v27  ;;  %v1004_v39 = vadd.f32 %v325_v33, %v244_v11  ;;  %v487_v61 = vmul.f32 %v479_v49, %v351_v21 }
  0xa1   : > { %770 = vrcp.f32 %v366_v28  ;;  %v356_v34 = vand.u32 2147483647, %v995_v29  ;;  %v1007_v42 = vmul.f32 0.70710677, %v1002_v37  ;;  %v1014_v62 = vmul.f32 0.5, %v303_v24 }
  0xa2   : > { %772 = vrcp.f32 %v367_v31  ;;  %v357_v35 = vand.u32 2147483647, %v998_v32  ;;  %v1010_v44 = vmul.f32 0.70710677, %v1004_v39  ;;  %v494_v3 = vmul.f32 1.442695, %v486_v51 }
  0xa3   : > { %v364_v36 = vmul.f32 0.3275911, %v356_v34  ;;  %v352_v46 = vand.u32 2147483647, %v1007_v42  ;;  %v484_v8 = vsub.f32 0.0, %v356_v34  ;;  %vm532_vm2 = vcmp.ge.f32.partialorder %v995_v29, 0.0 }
  0xa4   : > { %v365_v38 = vmul.f32 0.3275911, %v357_v35  ;;  %v353_v50 = vand.u32 2147483647, %v1010_v44  ;;  %v485_v10 = vsub.f32 0.0, %v357_v35  ;;  %vm533_vm3 = vcmp.ge.f32.partialorder %v998_v32, 0.0 }
  0xa5   : > { %v372_v41 = vadd.f32 1.0, %v364_v36  ;;  %v360_v53 = vmul.f32 0.3275911, %v352_v46  ;;  %v480_v11 = vsub.f32 0.0, %v352_v46  ;;  %v1027_v13 = vmul.f32 1.442695, %v487_v61 }
  0xa6   : > { %v373_v43 = vadd.f32 1.0, %v365_v38  ;;  %v299_v54 = vpop.f32.mrf.mxu0  ;;  %v361_v56 = vmul.f32 0.3275911, %v353_v50  ;;  %v481_v19 = vsub.f32 0.0, %v353_v50  ;;  %v492_v25 = vmul.f32 %v484_v8, %v356_v34 }
  0xa7   : > { %v771_v45 = vpop.eup %770  ;;  %774 = vrcp.f32 %v372_v41  ;;  %v328_v57 = vpop.f32.mrf.mxu1  ;;  %v368_v60 = vadd.f32 1.0, %v360_v53  ;;  %v1016_v0 = vadd.f32 %v299_v54, %v249_v59  ;;  %v493_v33 = vmul.f32 %v485_v10, %v357_v35 }
  0xa8   : > { %v773_v47 = vpop.eup %772  ;;  %v382_v48 = vmul.f32 %v771_v45, %v366_v28  ;;  %776 = vrcp.f32 %v373_v43  ;;  %v369_v63 = vadd.f32 1.0, %v361_v56  ;;  %v1020_v4 = vadd.f32 %v328_v57, %v249_v59 }
  0xa9   : > { %v383_v52 = vmul.f32 %v773_v47, %v367_v31  ;;  %778 = vrcp.f32 %v368_v60  ;;  %v1025_v12 = vmul.f32 0.70710677, %v1016_v0  ;;  %v488_v36 = vmul.f32 %v480_v11, %v352_v46 }
  0xaa   : > { %v390_v55 = vsub.f32 2.0, %v382_v48  ;;  %780 = vrcp.f32 %v369_v63  ;;  %v1030_v20 = vmul.f32 0.70710677, %v1020_v4  ;;  %v506_v46 = vmul.f32 1.442695, %v492_v25 }
  0xab   : > { %v391_v58 = vsub.f32 2.0, %v383_v52  ;;  %782 = vpow2.f32 %v494_v3  ;;  %v1033_v22 = vand.u32 2147483647, %v1025_v12  ;;  %vm528_vm4 = vcmp.ge.f32.partialorder %v1007_v42, 0.0 }
  0xac   : > { %v1018_v2 = vmul.f32 %v771_v45, %v390_v55  ;;  %v1039_v26 = vand.u32 2147483647, %v1030_v20  ;;  %vm529_vm6 = vcmp.ge.f32.partialorder %v1010_v44, 0.0  ;;  %vm530_vm8 = vcmp.ge.f32.partialorder %v1025_v12, 0.0 }
  0xad   : > { %v775_v1 = vpop.eup %774  ;;  %v1022_v6 = vmul.f32 %v773_v47, %v391_v58  ;;  %v362_v38 = vmul.f32 0.3275911, %v1033_v22  ;;  %vm531_vm9 = vcmp.ge.f32.partialorder %v1030_v20, 0.0  ;;  %v339_v44 = vmul.f32 0.5, %v1020_v4 }
  0xae   : > { %v777_v5 = vpop.eup %776  ;;  %v388_v7 = vmul.f32 %v775_v1, %v372_v41  ;;  %v406_v23 = vmul.f32 1.0614054, %v1018_v2  ;;  %v363_v45 = vmul.f32 0.3275911, %v1039_v26  ;;  %v336_v18 = vmul.f32 0.5, %v1002_v37 }
  0xaf   : > { %v389_v9 = vmul.f32 %v777_v5, %v373_v43  ;;  %v407_v28 = vmul.f32 1.0614054, %v1022_v6  ;;  %v779_v30 = vpop.eup %778  ;;  %v489_v43 = vmul.f32 %v481_v19, %v353_v50  ;;  %v370_v48 = vadd.f32 1.0, %v362_v38  ;;  %v566_v37 = vld [vmem:[%s1161_s3] sm:$0x7] }
  0xb0   : > { %v396_v15 = vsub.f32 2.0, %v388_v7  ;;  %v781_v40 = vpop.eup %780  ;;  %v384_v41 = vmul.f32 %v779_v30, %v368_v60  ;;  %v414_v51 = vadd.f32 -1.4531521, %v406_v23  ;;  %v371_v53 = vadd.f32 1.0, %v363_v45 }
  0xb1   : > { %v397_v21 = vsub.f32 2.0, %v389_v9  ;;  %v385_v34 = vmul.f32 %v781_v40, %v369_v63  ;;  %v415_v55 = vadd.f32 -1.4531521, %v407_v28  ;;  %v1048_v35 = vpop.eup %782  ;;  %784 = vrcp.f32 %v370_v48 }
  0xb2   : > { %v1036_v24 = vmul.f32 %v775_v1, %v396_v15  ;;  %v392_v52 = vsub.f32 2.0, %v384_v41  ;;  %v508_v50 = vmul.f32 1.442695, %v493_v33  ;;  %786 = vrcp.f32 %v371_v53 }
  0xb3   : > { %v1042_v31 = vmul.f32 %v777_v5, %v397_v21  ;;  %v393_v56 = vsub.f32 2.0, %v385_v34  ;;  %v498_v60 = vmul.f32 1.442695, %v488_v36  ;;  %v422_v1 = vmul.f32 %v414_v51, %v1018_v2 }
  0xb4   : > { %v412_v47 = vmul.f32 1.0614054, %v1036_v24  ;;  %v1050_v58 = vmul.f32 %v779_v30, %v392_v52  ;;  %v500_v3 = vmul.f32 1.442695, %v489_v43  ;;  %v423_v8 = vmul.f32 %v415_v55, %v1022_v6 }
  0xb5   : > { %v413_v49 = vmul.f32 1.0614054, %v1042_v31  ;;  %v1053_v61 = vmul.f32 %v781_v40, %v393_v56  ;;  %788 = vpow2.f32 %v506_v46  ;;  %v430_v11 = vadd.f32 1.4214138, %v422_v1 }
  0xb6   : > { %v420_v54 = vadd.f32 -1.4531521, %v412_v47  ;;  %v408_v7 = vmul.f32 1.0614054, %v1050_v58  ;;  %790 = vpow2.f32 %v508_v50  ;;  %v431_v21 = vadd.f32 1.4214138, %v423_v8 }
  0xb7   : > { %v421_v57 = vadd.f32 -1.4531521, %v413_v49  ;;  %v409_v10 = vmul.f32 1.0614054, %v1053_v61  ;;  %v785_v23 = vpop.eup %784  ;;  %792 = vpow2.f32 %v498_v60  ;;  %v438_v30 = vmul.f32 %v430_v11, %v1018_v2 }
  0xb8   : > { %v428_v59 = vmul.f32 %v420_v54, %v1036_v24  ;;  %v416_v19 = vadd.f32 -1.4531521, %v408_v7  ;;  %v787_v33 = vpop.eup %786  ;;  %v386_v36 = vmul.f32 %v785_v23, %v370_v48  ;;  %v439_v41 = vmul.f32 %v431_v21, %v1022_v6 }
  0xb9   : > { %v429_v63 = vmul.f32 %v421_v57, %v1042_v31  ;;  %v417_v28 = vadd.f32 -1.4531521, %v409_v10  ;;  %794 = vpow2.f32 %v500_v3  ;;  %v387_v43 = vmul.f32 %v787_v33, %v371_v53 }
  0xba   : > { %v436_v5 = vadd.f32 1.4214138, %v428_v59  ;;  %v424_v40 = vmul.f32 %v416_v19, %v1050_v58  ;;  %v394_v34 = vsub.f32 2.0, %v386_v36  ;;  %v446_v52 = vadd.f32 -0.28449672, %v438_v30 }
  0xbb   : > { %v437_v9 = vadd.f32 1.4214138, %v429_v63  ;;  %v425_v47 = vmul.f32 %v417_v28, %v1053_v61  ;;  %v789_v54 = vpop.eup %788  ;;  %v395_v55 = vsub.f32 2.0, %v387_v43  ;;  %v447_v56 = vadd.f32 -0.28449672, %v439_v41 }
  0xbc   : > { %v444_v15 = vmul.f32 %v436_v5, %v1036_v24  ;;  %v432_v51 = vadd.f32 1.4214138, %v424_v40  ;;  %v791_v57 = vpop.eup %790  ;;  %v1068_v50 = vmul.f32 %v785_v23, %v394_v34  ;;  %v482_v59 = vsub.f32 0.0, %v1033_v22 }
  0xbd   : > { %v445_v25 = vmul.f32 %v437_v9, %v1042_v31  ;;  %v433_v48 = vadd.f32 1.4214138, %v425_v47  ;;  %v793_v63 = vpop.eup %792  ;;  %v1073_v1 = vmul.f32 %v787_v33, %v395_v55  ;;  %v483_v3 = vsub.f32 0.0, %v1039_v26 }
  0xbe   : > { %v452_v38 = vadd.f32 -0.28449672, %v444_v15  ;;  %v440_v60 = vmul.f32 %v432_v51, %v1050_v58  ;;  %v410_v9 = vmul.f32 1.0614054, %v1068_v50  ;;  %v454_v11 = vmul.f32 %v446_v52, %v1018_v2 }
  0xbf   : > { %v453_v45 = vadd.f32 -0.28449672, %v445_v25  ;;  %v441_v7 = vmul.f32 %v433_v48, %v1053_v61  ;;  %v795_v15 = vpop.eup %794  ;;  %v411_v21 = vmul.f32 1.0614054, %v1073_v1  ;;  %v455_v25 = vmul.f32 %v447_v56, %v1022_v6 }
  0xc0   : > { %v460_v49 = vmul.f32 %v452_v38, %v1036_v24  ;;  %v448_v10 = vadd.f32 -0.28449672, %v440_v60  ;;  %v490_v28 = vmul.f32 %v482_v59, %v1033_v22  ;;  %v418_v33 = vadd.f32 -1.4531521, %v410_v9 }
  0xc1   : > { %v461_v46 = vmul.f32 %v453_v45, %v1042_v31  ;;  %v449_v23 = vadd.f32 -0.28449672, %v441_v7  ;;  %v419_v40 = vadd.f32 -1.4531521, %v411_v21  ;;  %v462_v34 = vadd.f32 0.2548296, %v454_v11 }
  0xc2   : > { %v468_v53 = vadd.f32 0.2548296, %v460_v49  ;;  %v456_v36 = vmul.f32 %v448_v10, %v1050_v58  ;;  %v426_v45 = vmul.f32 %v418_v33, %v1068_v50  ;;  %v463_v52 = vadd.f32 0.2548296, %v455_v25 }
  0xc3   : > { %v469_v5 = vadd.f32 0.2548296, %v461_v46  ;;  %v457_v41 = vmul.f32 %v449_v23, %v1053_v61  ;;  %v427_v49 = vmul.f32 %v419_v40, %v1073_v1  ;;  %796 = vpow2.f32 %v1027_v13 }
  0xc4   : > { %v476_v8 = vmul.f32 %v468_v53, %v1036_v24  ;;  %v491_v24 = vmul.f32 %v483_v3, %v1039_v26  ;;  %v464_v47 = vadd.f32 0.2548296, %v456_v36  ;;  %v502_v46 = vmul.f32 1.442695, %v490_v28 }
  0xc5   : > { %v477_v19 = vmul.f32 %v469_v5, %v1042_v31  ;;  %v567_v31 = vld [vmem:[%s1162_s4] sm:$0x7]  ;;  %v465_v51 = vadd.f32 0.2548296, %v457_v41  ;;  %v435_v56 = vadd.f32 1.4214138, %v427_v49  ;;  %v470_v3 = vmul.f32 %v462_v34, %v1018_v2 }
  0xc6   : > { %v516_v30 = vmul.f32 %v789_v54, %v476_v8  ;;  %570 = vperm.xlu2 %769, %v567_v31   ;;  %v434_v54 = vadd.f32 1.4214138, %v426_v45  ;;  %v472_v55 = vmul.f32 %v464_v47, %v1050_v58  ;;  %v504_v59 = vmul.f32 1.442695, %v491_v24 }
  0xc7   : > { %v517_v38 = vmul.f32 %v791_v57, %v477_v19  ;;  %v473_v57 = vmul.f32 %v465_v51, %v1053_v61  ;;  %v443_v7 = vmul.f32 %v435_v56, %v1073_v1  ;;  %v471_v58 = vmul.f32 %v463_v52, %v1022_v6 }
  0xc8   : > { %v524_v43 = vsub.f32 1.0, %v516_v30  ;;  %v442_v60 = vmul.f32 %v434_v54, %v1068_v50  ;;  %v341_v8 = vmul.f32 0.5, %v993_v27  ;;  %v512_v10 = vmul.f32 %v793_v63, %v472_v55 }
  0xc9   : > { %v525_v22 = vsub.f32 1.0, %v517_v38  ;;  %798 = vpow2.f32 %v502_v46  ;;  %v451_v11 = vadd.f32 -0.28449672, %v443_v7  ;;  %v513_v19 = vmul.f32 %v795_v15, %v473_v57  ;;  %v797_v21 = vpop.eup %796 }
  0xca   : > { %v540_v26 = vsub.f32 0.0, %v524_v43  ;;  %v450_v61 = vadd.f32 -0.28449672, %v442_v60  ;;  %800 = vpow2.f32 %v504_v59  ;;  %v510_v23 = vmul.f32 %v1048_v35, %v470_v3 }
  0xcb   : > { %v541_v48 = vsub.f32 0.0, %v525_v22  ;;  %v459_v6 = vmul.f32 %v451_v11, %v1073_v1  ;;  %v511_v25 = vmul.f32 %v797_v21, %v471_v58  ;;  %v520_v28 = vsub.f32 1.0, %v512_v10 }
  0xcc   : > { %v548_v53 = vsel %vm532_vm2, %v524_v43, %v540_v26  ;;  %v458_v32 = vmul.f32 %v450_v61, %v1068_v50  ;;  %v521_v30 = vsub.f32 1.0, %v513_v19  ;;  %v518_v33 = vsub.f32 1.0, %v510_v23 }
  0xcd   : > { %v556_v5 = vadd.f32 1.0, %v548_v53  ;;  %v549_v13 = vsel %vm533_vm3, %v525_v22, %v541_v48  ;;  %v467_v63 = vadd.f32 0.2548296, %v459_v6  ;;  %v519_v24 = vsub.f32 1.0, %v511_v25 }
  0xce   : > { %v557_v9 = vadd.f32 1.0, %v549_v13  ;;  %v466_v27 = vadd.f32 0.2548296, %v458_v32  ;;  %v536_v41 = vsub.f32 0.0, %v520_v28  ;;  %v537_v31 = vsub.f32 0.0, %v521_v30 }
  0xcf   : > { %v564_v29 = vmul.f32 %v556_v5, %v1014_v62  ;;  %v799_v15 = vpop.eup %798  ;;  %v475_v36 = vmul.f32 %v467_v63, %v1073_v1  ;;  %v534_v45 = vsub.f32 0.0, %v518_v33  ;;  %v535_v34 = vsub.f32 0.0, %v519_v24 }
  0xd0   : > { %v565_v2 = vmul.f32 %v557_v9, %v341_v8  ;;  %v474_v62 = vmul.f32 %v466_v27, %v1068_v50  ;;  %v801_v38 = vpop.eup %800  ;;  %v544_v22 = vsel %vm528_vm4, %v520_v28, %v536_v41  ;;  %v545_v49 = vsel %vm529_vm6, %v521_v30, %v537_v31 }
  0xd1   : > { %589 = vmatpush.msrb.mxu2 %v564_v29  ;;  %v515_v35 = vmul.f32 %v801_v38, %v475_v36  ;;  %v338_v51 = vmul.f32 0.5, %v1016_v0  ;;  %v542_v42 = vsel %vm526_vm5, %v518_v33, %v534_v45  ;;  %v552_v55 = vadd.f32 1.0, %v544_v22 }
  0xd2   : > { %609 = vmatpush.msrb.mxu3 %v565_v2  ;;  %v514_v40 = vmul.f32 %v799_v15, %v474_v62  ;;  %v543_v17 = vsel %vm527_vm7, %v519_v24, %v535_v34  ;;  %v553_v48 = vadd.f32 1.0, %v545_v49  ;;  %v550_v12 = vadd.f32 1.0, %v542_v42 }
  0xd3   : > { %v523_v47 = vsub.f32 1.0, %v515_v35  ;;  %v337_v57 = vmul.f32 0.5, %v1004_v39  ;;  %v551_v0 = vadd.f32 1.0, %v543_v17  ;;  %v334_v20 = vmul.f32 0.5, %v981_v14 }
  0xd4   : > { %v522_v43 = vsub.f32 1.0, %v514_v40  ;;  %v560_v53 = vmul.f32 %v552_v55, %v336_v18  ;;  %v335_v60 = vmul.f32 0.5, %v983_v16 }
  0xd5   : > { %v539_v1 = vsub.f32 0.0, %v523_v47  ;;  %v561_v4 = vmul.f32 %v553_v48, %v337_v57  ;;  %v558_v3 = vmul.f32 %v550_v12, %v334_v20 }
  0xd6   : > { %v538_v50 = vsub.f32 0.0, %v522_v43  ;;  %v559_v39 = vmul.f32 %v551_v0, %v335_v60 }
  0xd7   : > { %v547_v54 = vsel %vm531_vm9, %v523_v47, %v539_v1 }
  0xd8   : > { %v546_v52 = vsel %vm530_vm8, %v522_v43, %v538_v50  ;;  %v555_v46 = vadd.f32 1.0, %v547_v54 }
  0xd9   : > { %v554_v26 = vadd.f32 1.0, %v546_v52 }
  0xda   : > { %v563_v59 = vmul.f32 %v555_v46, %v339_v44 }
  0xdb   : > { %v562_v56 = vmul.f32 %v554_v26, %v338_v51 }
  0xdc   : > { %610 = vmatpush.msrb.mxu3 %v563_v59 }
  0xdd   : > { %590 = vmatpush.msrb.mxu2 %v562_v56 }
  0xde   : > { %611 = vmatpush.msrb.mxu3 %v561_v4 }
  0xdf   : > { %591 = vmatpush.msrb.mxu2 %v560_v53 }
  0xe0   : > { %612 = vmatpush.msrb.mxu3 %v559_v39 }
  0xe1   : > { %592 = vmatpush.msrb.mxu2 %v558_v3  ;;  %718 = vmatmul.msk.f32.vlgmr.msrb.gmra.mxu3 %vm573_vm10, %v566_v37 }
  0xe2   : > { %717 = vmatmul.msk.f32.vlgmr.msrb.gmra.mxu2 %vm573_vm10, %v566_v37 }
 0x120   : > { %v571_v14 = vpop.permute.xlu2 %570 }
 0x164   : > { %v614_v16 = vpop.f32.mrf.mxu3 }
 0x165   : > { %v594_v5 = vpop.f32.mrf.mxu2  ;;  %v615_v13 = vadd.f32 %v614_v16, %v571_v14 }
 0x166   : > { %v595_v58 = vadd.f32 %v594_v5, %v571_v14 }
 0x167   : > { %v619_v7 = vrot.slane %v615_v13, 4 }
 0x169   : > { %v621_v8 = vsel %vm620_vm11, %v595_v58, %v619_v7 }
 0x16a   : > { %623 = vst [vmem:[%s218_s26] sm:$0x77] %v621_v8 }
 0x16b   : > { %829 = shalt.err (!%p826_p3)
}
 0x16c   : > { %727 = dma.vmem_to_hbm [thread:$0]  (%p935_p5), %s639_s30, 128, %s641_s6, %s625_s22  }
 0x16d PF: > { %p733_p4 = scmp.ge.s32.totalorder %s864_s21, 2  ;;  %s652_s14 = sand.u32 1, %s852_s18  }
 0x16e   : > { %s653_s15 = scalar_lea.sflag [#allocation3], %s652_s14 }
 0x16f   : > { %p730_p7 = pnand %p733_p4, %p939_p6 }
 0x171   : > { %p731_p8 = pneg %p730_p7 }
 0x173   : > { %847 = dma.done.wait (%p731_p8), %s653_s15, 128  }
 0x174   : > { %849 = vsyncadd (%p731_p8), %s653_s15, 4294967168  ;;  %p15_p9 = scmp.ge.s32.totalorder %s922_s24, 4   ;;  %s1166_s18 = smov %s856_s19 }
 0x175   : > { %s1167_s19 = smov %s860_s20  ;;  %s1168_s20 = smov %s933_s27 }
 0x176   : > { %s1169_s21 = smov %s922_s24  ;;  %17 = sbr.rel (!%p15_p9) target bundleno = 3 (0x3), region = 75 }
 0x17b   :  { %659 = vsyncpa [#allocation3], 1 }
 0x17c   :  { %661 = vsyncpa [#allocation3 + $0x1], 1 }

</bundles_post_ra>
